<compile_context>
chip_gen: v5e
topology: v5e:2x2
jax: 0.10.0
libtpu: 0.0.40
codegen_flags: <defaults>
</compile_context>

<pallas_src>
import functools

import jax
import jax.numpy as jnp
import numpy as np
from jax.experimental import pallas as pl
from jax.experimental.pallas import tpu as pltpu


_COMPUTE_DTYPE = jnp.bfloat16  # MXU operand dtype; accumulation is always f32.


# ---------------------------------------------------------------------------
# Device / VMEM heuristics
# ---------------------------------------------------------------------------

def _device_info():
    """(total_vmem_bytes, has_multiple_tensorcores) for the local device."""
    kind = ""
    try:
        kind = jax.devices()[0].device_kind.lower()
    except Exception:
        pass
    is_v7 = ("v7" in kind) or ("7x" in kind)
    total_vmem = (64 if is_v7 else 128) * (1 << 20)   # v7x: 64 MiB per TC
    multi_tc = is_v7 or ("v4" in kind) or ("v5p" in kind)
    return total_vmem, multi_tc


def _estimate_vmem_bytes(b, q_len, seq_len, n_heads, d_model, d_k, d_v,
                         self_attn, attn_bytes):
    """Honest-ish per-grid-step VMEM estimate, including the 2x
    double-buffering of BlockSpec-managed blocks and in-kernel temporaries."""
    f32, bf16 = 4, 2
    dqk, dvv = n_heads * d_k, n_heads * d_v
    n_in_tokens = q_len if self_attn else q_len + 2 * seq_len
    # Double-buffered input / output blocks.
    io = 2 * (n_in_tokens * d_model * f32                   # activation inputs
              + q_len * d_model * f32                       # output block
              + n_heads * q_len * seq_len * attn_bytes)     # attn block
    # In-kernel intermediates (peak-ish, conservative).
    proj_cols = 2 * dqk + dvv
    inter = (n_in_tokens * d_model * bf16                   # bf16 activation copy
             + n_in_tokens * proj_cols * (f32 + bf16)       # proj f32 transient + bf16
             + 3 * q_len * seq_len * f32                    # scores / exp / attn (1 head)
             + 2 * q_len * dvv * bf16                       # ctx slab
             + q_len * d_model * f32)                       # projected output f32
    return b * (io + inter)


def _pick_b_tile(bs, q_len, seq_len, n_heads, d_model, d_k, d_v,
                 self_attn, attn_bytes):
    """Largest batch tile that fits the per-chip VMEM budget; keep >= 2 grid
    steps only on multi-TensorCore parts; prefer M = b_tile*q_len % 256 == 0."""
    total_vmem, multi_tc = _device_info()
    budget = total_vmem // 3          # headroom for weights / compiler scratch
    best, best_aligned = 1, None
    for cand in range(1, bs + 1):
        if bs % cand:
            continue
        if multi_tc and bs >= 2 and bs // cand < 2:
            continue
        if _estimate_vmem_bytes(cand, q_len, seq_len, n_heads, d_model,
                                d_k, d_v, self_attn, attn_bytes) > budget:
            continue
        best = cand
        if (cand * q_len) % 256 == 0:
            best_aligned = cand
    if best_aligned is not None and 2 * best_aligned >= best:
        return best_aligned
    return best


def _vmem_limit_bytes():
    total_vmem, _ = _device_info()
    return int(total_vmem * 3 // 4)


# ---------------------------------------------------------------------------
# Kernels
# ---------------------------------------------------------------------------

def _attention_core(q_s, k_s, v_s, wo_ref, bo_ref, out_ref, attn_ref, *,
                    n_heads, d_k, d_v):
    """Shared attention core.

    q_s: [B, Lq, H*d_k] bf16 (softmax scale already folded into W_Q / b_Q)
    k_s: [B, Lk, H*d_k] bf16
    v_s: [B, Lk, H*d_v] bf16
    """
    B, Lq, _ = q_s.shape
    d_model = out_ref.shape[-1]
    cd = _COMPUTE_DTYPE

    ctx_heads = []
    for h in range(n_heads):                          # static unroll over heads
        qh = q_s[:, :, h * d_k:(h + 1) * d_k]         # [B, Lq, d_k]
        kh = k_s[:, :, h * d_k:(h + 1) * d_k]         # [B, Lk, d_k]
        vh = v_s[:, :, h * d_v:(h + 1) * d_v]         # [B, Lk, d_v]

        # scores = q @ k^T  (scale pre-folded into W_Q); f32 MXU accumulation.
        scores = jnp.einsum('bqd,bkd->bqk', qh, kh,
                            preferred_element_type=jnp.float32)   # [B, Lq, Lk]

        # Numerically stable softmax in f32; exact divide so returned attention
        # rows sum to 1 (matches the PyTorch softmax semantics).
        m = jnp.max(scores, axis=-1, keepdims=True)
        e = jnp.exp(scores - m)
        attn = e / jnp.sum(e, axis=-1, keepdims=True)

        if attn_ref is not None:
            # Direct per-head store: full lane-dense (Lq, Lk) tile; this head's
            # attn dies immediately (no stack keeping all heads live).
            attn_ref[:, h, :, :] = attn.astype(attn_ref.dtype)

        # Per-head context, bf16 for the fused output projection below.
        ctx = jnp.einsum('bqk,bkd->bqd', attn.astype(cd), vh,
                         preferred_element_type=jnp.float32)      # [B, Lq, d_v]
        ctx_heads.append(ctx.astype(cd))

    # Lane-contiguous context slab -> ONE output projection with a
    # d_model-deep contraction (fills the MXU; no per-head f32 accumulator).
    ctx_all = jnp.concatenate(ctx_heads, axis=-1).reshape(B * Lq, n_heads * d_v)
    out = jnp.dot(ctx_all, wo_ref[...], preferred_element_type=jnp.float32)
    out = out + bo_ref[...]
    out_ref[...] = out.reshape(B, Lq, d_model).astype(out_ref.dtype)


def _mha_self_kernel(x_ref, wqkv_ref, bqkv_ref, wo_ref, bo_ref,
                     out_ref, attn_ref=None, *, n_heads, d_k, d_v):
    """Self-attention fast path (K = V = Q): one fused QKV projection matmul."""
    B, L, D = x_ref.shape
    cd = _COMPUTE_DTYPE
    x2 = x_ref[...].reshape(B * L, D).astype(cd)
    # Cast to bf16 right after the bias add so the f32 projection never stays
    # live alongside the bf16 copy.
    qkv = (jnp.dot(x2, wqkv_ref[...], preferred_element_type=jnp.float32)
           + bqkv_ref[...]).astype(cd)
    qkv = qkv.reshape(B, L, -1)
    hdk = n_heads * d_k
    _attention_core(qkv[:, :, :hdk], qkv[:, :, hdk:2 * hdk], qkv[:, :, 2 * hdk:],
                    wo_ref, bo_ref, out_ref, attn_ref,
                    n_heads=n_heads, d_k=d_k, d_v=d_v)


def _mha_cross_kernel(q_ref, k_ref, v_ref,
                      wq_ref, bq_ref, wk_ref, bk_ref, wv_ref, bv_ref,
                      wo_ref, bo_ref, out_ref, attn_ref=None, *,
                      n_heads, d_k, d_v):
    """General path (distinct Q / K / V inputs), batch-flattened projections."""
    B, Lq, D = q_ref.shape
    Lk = k_ref.shape[1]
    cd = _COMPUTE_DTYPE
    q2 = q_ref[...].reshape(B * Lq, D).astype(cd)
    k2 = k_ref[...].reshape(B * Lk, D).astype(cd)
    v2 = v_ref[...].reshape(B * Lk, D).astype(cd)
    q_s = (jnp.dot(q2, wq_ref[...], preferred_element_type=jnp.float32)
           + bq_ref[...]).astype(cd).reshape(B, Lq, -1)
    k_s = (jnp.dot(k2, wk_ref[...], preferred_element_type=jnp.float32)
           + bk_ref[...]).astype(cd).reshape(B, Lk, -1)
    v_s = (jnp.dot(v2, wv_ref[...], preferred_element_type=jnp.float32)
           + bv_ref[...]).astype(cd).reshape(B, Lk, -1)
    _attention_core(q_s, k_s, v_s, wo_ref, bo_ref, out_ref, attn_ref,
                    n_heads=n_heads, d_k=d_k, d_v=d_v)


# ---------------------------------------------------------------------------
# Wrapper
# ---------------------------------------------------------------------------

def _full_spec(arr):
    nd = arr.ndim
    return pl.BlockSpec(arr.shape, lambda b, _nd=nd: (0,) * _nd)


def multihead_attention(Q, K=None, V=None, *, params, n_heads, d_k, d_v,
                        return_attn=True, attn_dtype=jnp.float32, b_tile=None):
    """Forward pass of `_MultiheadAttention` (eval mode, no masks, no prev)."""
    if K is None:
        K = Q
    if V is None:
        V = Q
    bs, q_len, d_model = Q.shape
    seq_len = K.shape[1]
    head_dim = d_model // n_heads
    scale = float(head_dim) ** (-0.5)   # frozen parameter (lsa=False)

    cd = _COMPUTE_DTYPE
    # Fold the softmax scale into W_Q / b_Q; pre-cast matmul weights to bf16
    # (MXU fast path, halves weight DMA); biases stay f32 (added in f32).
    wq = (params["wq"] * scale).astype(cd)
    bq = (params["bq"] * scale).astype(jnp.float32)
    wk = params["wk"].astype(cd)
    bk = params["bk"].astype(jnp.float32)
    wv = params["wv"].astype(cd)
    bv = params["bv"].astype(jnp.float32)
    wo = params["wo"].astype(cd)
    bo = params["bo"].astype(jnp.float32)

    self_attn = (K is Q) and (V is Q)
    attn_bytes = np.dtype(attn_dtype).itemsize if return_attn else 0

    if b_tile is None:
        b_tile = _pick_b_tile(bs, q_len, seq_len, n_heads, d_model, d_k, d_v,
                              self_attn, attn_bytes)
    if bs % b_tile != 0:
        raise ValueError(f"b_tile={b_tile} must divide bs={bs}")
    grid = (bs // b_tile,)

    if self_attn:
        wqkv = jnp.concatenate([wq, wk, wv], axis=1)   # [d_model, 2*H*d_k + H*d_v]
        bqkv = jnp.concatenate([bq, bk, bv], axis=1)
        kernel = functools.partial(_mha_self_kernel, n_heads=n_heads, d_k=d_k, d_v=d_v)
        inputs = (Q, wqkv, bqkv, wo, bo)
        in_specs = [pl.BlockSpec((b_tile, q_len, d_model), lambda b: (b, 0, 0)),
                    _full_spec(wqkv), _full_spec(bqkv), _full_spec(wo), _full_spec(bo)]
    else:
        kernel = functools.partial(_mha_cross_kernel, n_heads=n_heads, d_k=d_k, d_v=d_v)
        inputs = (Q, K, V, wq, bq, wk, bk, wv, bv, wo, bo)
        in_specs = [pl.BlockSpec((b_tile, q_len, d_model), lambda b: (b, 0, 0)),
                    pl.BlockSpec((b_tile, seq_len, d_model), lambda b: (b, 0, 0)),
                    pl.BlockSpec((b_tile, seq_len, d_model), lambda b: (b, 0, 0)),
                    _full_spec(wq), _full_spec(bq), _full_spec(wk), _full_spec(bk),
                    _full_spec(wv), _full_spec(bv), _full_spec(wo), _full_spec(bo)]

    out_shapes = [jax.ShapeDtypeStruct((bs, q_len, d_model), jnp.float32)]
    out_specs = [pl.BlockSpec((b_tile, q_len, d_model), lambda b: (b, 0, 0))]
    if return_attn:
        out_shapes.append(
            jax.ShapeDtypeStruct((bs, n_heads, q_len, seq_len), attn_dtype))
        out_specs.append(
            pl.BlockSpec((b_tile, n_heads, q_len, seq_len), lambda b: (b, 0, 0, 0)))

    results = pl.pallas_call(
        kernel,
        grid=grid,
        in_specs=in_specs,
        out_specs=out_specs,
        out_shape=out_shapes,
        compiler_params=pltpu.CompilerParams(
            dimension_semantics=("parallel",),
            vmem_limit_bytes=_vmem_limit_bytes()),
    )(*inputs)

    if return_attn:
        out, attn = results
        return out, attn
    (out,) = results
    return out


# ---------------------------------------------------------------------------
# Reference + test
# ---------------------------------------------------------------------------

def _reference(Q, K, V, params, *, n_heads, d_k, d_v):
    """Pure-JAX f32 reference mirroring the PyTorch forward."""
    bs, q_len, d_model = Q.shape
    scale = float(d_model // n_heads) ** (-0.5)
    q_s = (Q @ params["wq"] + params["bq"]).reshape(bs, -1, n_heads, d_k).transpose(0, 2, 1, 3)
    k_s = (K @ params["wk"] + params["bk"]).reshape(bs, -1, n_heads, d_k).transpose(0, 2, 3, 1)
    v_s = (V @ params["wv"] + params["bv"]).reshape(bs, -1, n_heads, d_v).transpose(0, 2, 1, 3)
    scores = jnp.einsum("bhqd,bhdk->bhqk", q_s, k_s) * scale
    attn = jax.nn.softmax(scores, axis=-1)
    out = jnp.einsum("bhqk,bhkd->bhqd", attn, v_s)
    out = out.transpose(0, 2, 1, 3).reshape(bs, q_len, n_heads * d_v)
    out = out @ params["wo"] + params["bo"]
    return out, attn


if __name__ == "__main__":
    # Small shapes consistent with the module.
    bs, seq_len, d_model, n_heads = 2, 8, 32, 4
    d_k = d_v = d_model // n_heads

    key = jax.random.PRNGKey(0)
    keys = jax.random.split(key, 12)

    def init_linear(kw, kb, fan_in, fan_out):
        bound = 1.0 / np.sqrt(fan_in)
        w = jax.random.uniform(kw, (fan_in, fan_out), jnp.float32, -bound, bound)
        b = jax.random.uniform(kb, (1, fan_out), jnp.float32, -bound, bound)
        return w, b

    wq, bq = init_linear(keys[0], keys[1], d_model, n_heads * d_k)
    wk, bk = init_linear(keys[2], keys[3], d_model, n_heads * d_k)
    wv, bv = init_linear(keys[4], keys[5], d_model, n_heads * d_v)
    wo, bo = init_linear(keys[6], keys[7], n_heads * d_v, d_model)
    params = dict(wq=wq, bq=bq, wk=wk, bk=bk, wv=wv, bv=bv, wo=wo, bo=bo)

    Q = jax.random.normal(keys[8], (bs, seq_len, d_model), jnp.float32)

    # --- Self-attention (module default K = V = None -> Q): fused-QKV fast path.
    out, attn = multihead_attention(Q, params=params, n_heads=n_heads, d_k=d_k, d_v=d_v)
    out = jax.block_until_ready(out)
    attn = jax.block_until_ready(attn)
    ref_out, ref_attn = _reference(Q, Q, Q, params, n_heads=n_heads, d_k=d_k, d_v=d_v)
    # bf16 MXU operands -> looser tolerance than a pure-f32 kernel.
    np.testing.assert_allclose(np.asarray(out), np.asarray(ref_out), rtol=2e-2, atol=2e-2)
    np.testing.assert_allclose(np.asarray(attn), np.asarray(ref_attn), rtol=2e-2, atol=2e-2)

    # --- General cross-attention path (distinct K, V).
    K = jax.random.normal(keys[9], (bs, seq_len, d_model), jnp.float32)
    V = jax.random.normal(keys[10], (bs, seq_len, d_model), jnp.float32)
    out2, attn2 = multihead_attention(Q, K, V, params=params,
                                      n_heads=n_heads, d_k=d_k, d_v=d_v)
    out2 = jax.block_until_ready(out2)
    attn2 = jax.block_until_ready(attn2)
    ref_out2, ref_attn2 = _reference(Q, K, V, params, n_heads=n_heads, d_k=d_k, d_v=d_v)
    np.testing.assert_allclose(np.asarray(out2), np.asarray(ref_out2), rtol=2e-2, atol=2e-2)
    np.testing.assert_allclose(np.asarray(attn2), np.asarray(ref_attn2), rtol=2e-2, atol=2e-2)

    print("KERNEL_OK")
</pallas_src>

<mosaic_0001>
module attributes {stable_mosaic.version = 11 : i64} {
  func.func @_mha_self_kernel(%arg0: i32, %arg1: memref<2x8x32xf32, #tpu.memory_space<vmem>>, %arg2: memref<32x96xbf16, #tpu.memory_space<vmem>>, %arg3: memref<1x96xf32, #tpu.memory_space<vmem>>, %arg4: memref<32x32xbf16, #tpu.memory_space<vmem>>, %arg5: memref<1x32xf32, #tpu.memory_space<vmem>>, %arg6: memref<2x8x32xf32, #tpu.memory_space<vmem>>, %arg7: memref<2x4x8x8xf32, #tpu.memory_space<vmem>>) attributes {dimension_semantics = [#tpu.dimension_semantics<parallel>], iteration_bounds = array<i64: 1>, scalar_prefetch = 0 : i64, scratch_operands = 0 : i64, tpu.core_type = #tpu.core_type<tc>, window_params = [{transform_indices = @transform_0, window_bounds = array<i64: 2, 8, 32>}, {pipeline_mode = #tpu.pipeline_mode<synchronous>, transform_indices = @transform_1, window_bounds = array<i64: 32, 96>}, {pipeline_mode = #tpu.pipeline_mode<synchronous>, transform_indices = @transform_2, window_bounds = array<i64: 1, 96>}, {pipeline_mode = #tpu.pipeline_mode<synchronous>, transform_indices = @transform_3, window_bounds = array<i64: 32, 32>}, {pipeline_mode = #tpu.pipeline_mode<synchronous>, transform_indices = @transform_4, window_bounds = array<i64: 1, 32>}, {transform_indices = @transform_5, window_bounds = array<i64: 2, 8, 32>}, {transform_indices = @transform_6, window_bounds = array<i64: 2, 4, 8, 8>}]} {
    %c0 = arith.constant 0 : index
    %c0_0 = arith.constant 0 : index
    %c0_1 = arith.constant 0 : index
    %0 = vector.load %arg1[%c0, %c0_0, %c0_1] : memref<2x8x32xf32, #tpu.memory_space<vmem>>, vector<2x8x32xf32>
    %1 = vector.shape_cast %0 : vector<2x8x32xf32> to vector<16x32xf32>
    %2 = arith.truncf %1 : vector<16x32xf32> to vector<16x32xbf16>
    %c0_2 = arith.constant 0 : index
    %c0_3 = arith.constant 0 : index
    %3 = vector.load %arg2[%c0_2, %c0_3] : memref<32x96xbf16, #tpu.memory_space<vmem>>, vector<32x96xbf16>
    %cst = arith.constant dense<0.000000e+00> : vector<16x96xf32>
    %4 = tpu.matmul %2, %3, %cst {dimension_numbers = #tpu.dot_dimension_numbers<[1], [0], [0], [1], [0, 0, 1, 1], [], []>} : vector<16x32xbf16>, vector<32x96xbf16>, vector<16x96xf32> -> vector<16x96xf32>
    %c0_4 = arith.constant 0 : index
    %c0_5 = arith.constant 0 : index
    %5 = vector.load %arg3[%c0_4, %c0_5] : memref<1x96xf32, #tpu.memory_space<vmem>>, vector<1x96xf32>
    %6 = vector.broadcast %5 : vector<1x96xf32> to vector<16x96xf32>
    %7 = arith.addf %4, %6 : vector<16x96xf32>
    %8 = arith.truncf %7 : vector<16x96xf32> to vector<16x96xbf16>
    %9 = vector.shape_cast %8 : vector<16x96xbf16> to vector<2x8x96xbf16>
    %10 = vector.extract_strided_slice %9 {offsets = [0, 0, 0], sizes = [2, 8, 32], strides = [1, 1, 1]} : vector<2x8x96xbf16> to vector<2x8x32xbf16>
    %11 = vector.extract_strided_slice %9 {offsets = [0, 0, 32], sizes = [2, 8, 32], strides = [1, 1, 1]} : vector<2x8x96xbf16> to vector<2x8x32xbf16>
    %12 = vector.extract_strided_slice %9 {offsets = [0, 0, 64], sizes = [2, 8, 32], strides = [1, 1, 1]} : vector<2x8x96xbf16> to vector<2x8x32xbf16>
    %13 = vector.extract_strided_slice %10 {offsets = [0, 0, 0], sizes = [2, 8, 8], strides = [1, 1, 1]} : vector<2x8x32xbf16> to vector<2x8x8xbf16>
    %14 = vector.extract_strided_slice %11 {offsets = [0, 0, 0], sizes = [2, 8, 8], strides = [1, 1, 1]} : vector<2x8x32xbf16> to vector<2x8x8xbf16>
    %15 = vector.extract_strided_slice %12 {offsets = [0, 0, 0], sizes = [2, 8, 8], strides = [1, 1, 1]} : vector<2x8x32xbf16> to vector<2x8x8xbf16>
    "tpu.trace_start"() <{level = 10 : i32, message = "bqd,bkd->bqk"}> : () -> ()
    %cst_6 = arith.constant dense<0.000000e+00> : vector<2x8x8xf32>
    %16 = tpu.matmul %13, %14, %cst_6 {dimension_numbers = #tpu.dot_dimension_numbers<[2], [2], [1], [1], [0, 0, 0, 1, 1, 1], [0], [0]>} : vector<2x8x8xbf16>, vector<2x8x8xbf16>, vector<2x8x8xf32> -> vector<2x8x8xf32>
    "tpu.trace_stop"() : () -> ()
    %cst_7 = arith.constant dense<0xFF800000> : vector<2x8xf32>
    %17 = vector.multi_reduction <maximumf>, %16, %cst_7 [2] : vector<2x8x8xf32> to vector<2x8xf32>
    %18 = vector.shape_cast %17 : vector<2x8xf32> to vector<2x8x1xf32>
    %19 = vector.broadcast %18 : vector<2x8x1xf32> to vector<2x8x8xf32>
    %20 = arith.subf %16, %19 : vector<2x8x8xf32>
    %21 = math.exp %20 : vector<2x8x8xf32>
    %cst_8 = arith.constant dense<0.000000e+00> : vector<2x8xf32>
    %22 = vector.multi_reduction <add>, %21, %cst_8 [2] : vector<2x8x8xf32> to vector<2x8xf32>
    %23 = vector.shape_cast %22 : vector<2x8xf32> to vector<2x8x1xf32>
    %24 = vector.broadcast %23 : vector<2x8x1xf32> to vector<2x8x8xf32>
    %25 = arith.divf %21, %24 : vector<2x8x8xf32>
    %c0_9 = arith.constant 0 : index
    %c0_10 = arith.constant 0 : index
    %c0_11 = arith.constant 0 : index
    %c0_12 = arith.constant 0 : index
    %26 = vector.load %arg7[%c0_9, %c0_10, %c0_11, %c0_12] : memref<2x4x8x8xf32, #tpu.memory_space<vmem>>, vector<2x1x8x8xf32>
    %27 = vector.shape_cast %26 : vector<2x1x8x8xf32> to vector<2x8x8xf32>
    %28 = vector.shape_cast %25 : vector<2x8x8xf32> to vector<2x1x8x8xf32>
    tpu.vector_store %arg7[%c0_9, %c0_10, %c0_11, %c0_12], %28 {strides = array<i32>} : memref<2x4x8x8xf32, #tpu.memory_space<vmem>>, vector<2x1x8x8xf32>,
    %29 = arith.truncf %25 : vector<2x8x8xf32> to vector<2x8x8xbf16>
    "tpu.trace_start"() <{level = 10 : i32, message = "bqk,bkd->bqd"}> : () -> ()
    %cst_13 = arith.constant dense<0.000000e+00> : vector<2x8x8xf32>
    %30 = tpu.matmul %29, %15, %cst_13 {dimension_numbers = #tpu.dot_dimension_numbers<[2], [1], [1], [2], [0, 0, 0, 1, 1, 2], [0], [0]>} : vector<2x8x8xbf16>, vector<2x8x8xbf16>, vector<2x8x8xf32> -> vector<2x8x8xf32>
    "tpu.trace_stop"() : () -> ()
    %31 = arith.truncf %30 : vector<2x8x8xf32> to vector<2x8x8xbf16>
    %32 = vector.extract_strided_slice %10 {offsets = [0, 0, 8], sizes = [2, 8, 8], strides = [1, 1, 1]} : vector<2x8x32xbf16> to vector<2x8x8xbf16>
    %33 = vector.extract_strided_slice %11 {offsets = [0, 0, 8], sizes = [2, 8, 8], strides = [1, 1, 1]} : vector<2x8x32xbf16> to vector<2x8x8xbf16>
    %34 = vector.extract_strided_slice %12 {offsets = [0, 0, 8], sizes = [2, 8, 8], strides = [1, 1, 1]} : vector<2x8x32xbf16> to vector<2x8x8xbf16>
    "tpu.trace_start"() <{level = 10 : i32, message = "bqd,bkd->bqk"}> : () -> ()
    %cst_14 = arith.constant dense<0.000000e+00> : vector<2x8x8xf32>
    %35 = tpu.matmul %32, %33, %cst_14 {dimension_numbers = #tpu.dot_dimension_numbers<[2], [2], [1], [1], [0, 0, 0, 1, 1, 1], [0], [0]>} : vector<2x8x8xbf16>, vector<2x8x8xbf16>, vector<2x8x8xf32> -> vector<2x8x8xf32>
    "tpu.trace_stop"() : () -> ()
    %cst_15 = arith.constant dense<0xFF800000> : vector<2x8xf32>
    %36 = vector.multi_reduction <maximumf>, %35, %cst_15 [2] : vector<2x8x8xf32> to vector<2x8xf32>
    %37 = vector.shape_cast %36 : vector<2x8xf32> to vector<2x8x1xf32>
    %38 = vector.broadcast %37 : vector<2x8x1xf32> to vector<2x8x8xf32>
    %39 = arith.subf %35, %38 : vector<2x8x8xf32>
    %40 = math.exp %39 : vector<2x8x8xf32>
    %cst_16 = arith.constant dense<0.000000e+00> : vector<2x8xf32>
    %41 = vector.multi_reduction <add>, %40, %cst_16 [2] : vector<2x8x8xf32> to vector<2x8xf32>
    %42 = vector.shape_cast %41 : vector<2x8xf32> to vector<2x8x1xf32>
    %43 = vector.broadcast %42 : vector<2x8x1xf32> to vector<2x8x8xf32>
    %44 = arith.divf %40, %43 : vector<2x8x8xf32>
    %c0_17 = arith.constant 0 : index
    %c1 = arith.constant 1 : index
    %c0_18 = arith.constant 0 : index
    %c0_19 = arith.constant 0 : index
    %45 = vector.load %arg7[%c0_17, %c1, %c0_18, %c0_19] : memref<2x4x8x8xf32, #tpu.memory_space<vmem>>, vector<2x1x8x8xf32>
    %46 = vector.shape_cast %45 : vector<2x1x8x8xf32> to vector<2x8x8xf32>
    %47 = vector.shape_cast %44 : vector<2x8x8xf32> to vector<2x1x8x8xf32>
    tpu.vector_store %arg7[%c0_17, %c1, %c0_18, %c0_19], %47 {strides = array<i32>} : memref<2x4x8x8xf32, #tpu.memory_space<vmem>>, vector<2x1x8x8xf32>,
    %48 = arith.truncf %44 : vector<2x8x8xf32> to vector<2x8x8xbf16>
    "tpu.trace_start"() <{level = 10 : i32, message = "bqk,bkd->bqd"}> : () -> ()
    %cst_20 = arith.constant dense<0.000000e+00> : vector<2x8x8xf32>
    %49 = tpu.matmul %48, %34, %cst_20 {dimension_numbers = #tpu.dot_dimension_numbers<[2], [1], [1], [2], [0, 0, 0, 1, 1, 2], [0], [0]>} : vector<2x8x8xbf16>, vector<2x8x8xbf16>, vector<2x8x8xf32> -> vector<2x8x8xf32>
    "tpu.trace_stop"() : () -> ()
    %50 = arith.truncf %49 : vector<2x8x8xf32> to vector<2x8x8xbf16>
    %51 = vector.extract_strided_slice %10 {offsets = [0, 0, 16], sizes = [2, 8, 8], strides = [1, 1, 1]} : vector<2x8x32xbf16> to vector<2x8x8xbf16>
    %52 = vector.extract_strided_slice %11 {offsets = [0, 0, 16], sizes = [2, 8, 8], strides = [1, 1, 1]} : vector<2x8x32xbf16> to vector<2x8x8xbf16>
    %53 = vector.extract_strided_slice %12 {offsets = [0, 0, 16], sizes = [2, 8, 8], strides = [1, 1, 1]} : vector<2x8x32xbf16> to vector<2x8x8xbf16>
    "tpu.trace_start"() <{level = 10 : i32, message = "bqd,bkd->bqk"}> : () -> ()
    %cst_21 = arith.constant dense<0.000000e+00> : vector<2x8x8xf32>
    %54 = tpu.matmul %51, %52, %cst_21 {dimension_numbers = #tpu.dot_dimension_numbers<[2], [2], [1], [1], [0, 0, 0, 1, 1, 1], [0], [0]>} : vector<2x8x8xbf16>, vector<2x8x8xbf16>, vector<2x8x8xf32> -> vector<2x8x8xf32>
    "tpu.trace_stop"() : () -> ()
    %cst_22 = arith.constant dense<0xFF800000> : vector<2x8xf32>
    %55 = vector.multi_reduction <maximumf>, %54, %cst_22 [2] : vector<2x8x8xf32> to vector<2x8xf32>
    %56 = vector.shape_cast %55 : vector<2x8xf32> to vector<2x8x1xf32>
    %57 = vector.broadcast %56 : vector<2x8x1xf32> to vector<2x8x8xf32>
    %58 = arith.subf %54, %57 : vector<2x8x8xf32>
    %59 = math.exp %58 : vector<2x8x8xf32>
    %cst_23 = arith.constant dense<0.000000e+00> : vector<2x8xf32>
    %60 = vector.multi_reduction <add>, %59, %cst_23 [2] : vector<2x8x8xf32> to vector<2x8xf32>
    %61 = vector.shape_cast %60 : vector<2x8xf32> to vector<2x8x1xf32>
    %62 = vector.broadcast %61 : vector<2x8x1xf32> to vector<2x8x8xf32>
    %63 = arith.divf %59, %62 : vector<2x8x8xf32>
    %c0_24 = arith.constant 0 : index
    %c2 = arith.constant 2 : index
    %c0_25 = arith.constant 0 : index
    %c0_26 = arith.constant 0 : index
    %64 = vector.load %arg7[%c0_24, %c2, %c0_25, %c0_26] : memref<2x4x8x8xf32, #tpu.memory_space<vmem>>, vector<2x1x8x8xf32>
    %65 = vector.shape_cast %64 : vector<2x1x8x8xf32> to vector<2x8x8xf32>
    %66 = vector.shape_cast %63 : vector<2x8x8xf32> to vector<2x1x8x8xf32>
    tpu.vector_store %arg7[%c0_24, %c2, %c0_25, %c0_26], %66 {strides = array<i32>} : memref<2x4x8x8xf32, #tpu.memory_space<vmem>>, vector<2x1x8x8xf32>,
    %67 = arith.truncf %63 : vector<2x8x8xf32> to vector<2x8x8xbf16>
    "tpu.trace_start"() <{level = 10 : i32, message = "bqk,bkd->bqd"}> : () -> ()
    %cst_27 = arith.constant dense<0.000000e+00> : vector<2x8x8xf32>
    %68 = tpu.matmul %67, %53, %cst_27 {dimension_numbers = #tpu.dot_dimension_numbers<[2], [1], [1], [2], [0, 0, 0, 1, 1, 2], [0], [0]>} : vector<2x8x8xbf16>, vector<2x8x8xbf16>, vector<2x8x8xf32> -> vector<2x8x8xf32>
    "tpu.trace_stop"() : () -> ()
    %69 = arith.truncf %68 : vector<2x8x8xf32> to vector<2x8x8xbf16>
    %70 = vector.extract_strided_slice %10 {offsets = [0, 0, 24], sizes = [2, 8, 8], strides = [1, 1, 1]} : vector<2x8x32xbf16> to vector<2x8x8xbf16>
    %71 = vector.extract_strided_slice %11 {offsets = [0, 0, 24], sizes = [2, 8, 8], strides = [1, 1, 1]} : vector<2x8x32xbf16> to vector<2x8x8xbf16>
    %72 = vector.extract_strided_slice %12 {offsets = [0, 0, 24], sizes = [2, 8, 8], strides = [1, 1, 1]} : vector<2x8x32xbf16> to vector<2x8x8xbf16>
    "tpu.trace_start"() <{level = 10 : i32, message = "bqd,bkd->bqk"}> : () -> ()
    %cst_28 = arith.constant dense<0.000000e+00> : vector<2x8x8xf32>
    %73 = tpu.matmul %70, %71, %cst_28 {dimension_numbers = #tpu.dot_dimension_numbers<[2], [2], [1], [1], [0, 0, 0, 1, 1, 1], [0], [0]>} : vector<2x8x8xbf16>, vector<2x8x8xbf16>, vector<2x8x8xf32> -> vector<2x8x8xf32>
    "tpu.trace_stop"() : () -> ()
    %cst_29 = arith.constant dense<0xFF800000> : vector<2x8xf32>
    %74 = vector.multi_reduction <maximumf>, %73, %cst_29 [2] : vector<2x8x8xf32> to vector<2x8xf32>
    %75 = vector.shape_cast %74 : vector<2x8xf32> to vector<2x8x1xf32>
    %76 = vector.broadcast %75 : vector<2x8x1xf32> to vector<2x8x8xf32>
    %77 = arith.subf %73, %76 : vector<2x8x8xf32>
    %78 = math.exp %77 : vector<2x8x8xf32>
    %cst_30 = arith.constant dense<0.000000e+00> : vector<2x8xf32>
    %79 = vector.multi_reduction <add>, %78, %cst_30 [2] : vector<2x8x8xf32> to vector<2x8xf32>
    %80 = vector.shape_cast %79 : vector<2x8xf32> to vector<2x8x1xf32>
    %81 = vector.broadcast %80 : vector<2x8x1xf32> to vector<2x8x8xf32>
    %82 = arith.divf %78, %81 : vector<2x8x8xf32>
    %c0_31 = arith.constant 0 : index
    %c3 = arith.constant 3 : index
    %c0_32 = arith.constant 0 : index
    %c0_33 = arith.constant 0 : index
    %83 = vector.load %arg7[%c0_31, %c3, %c0_32, %c0_33] : memref<2x4x8x8xf32, #tpu.memory_space<vmem>>, vector<2x1x8x8xf32>
    %84 = vector.shape_cast %83 : vector<2x1x8x8xf32> to vector<2x8x8xf32>
    %85 = vector.shape_cast %82 : vector<2x8x8xf32> to vector<2x1x8x8xf32>
    tpu.vector_store %arg7[%c0_31, %c3, %c0_32, %c0_33], %85 {strides = array<i32>} : memref<2x4x8x8xf32, #tpu.memory_space<vmem>>, vector<2x1x8x8xf32>,
    %86 = arith.truncf %82 : vector<2x8x8xf32> to vector<2x8x8xbf16>
    "tpu.trace_start"() <{level = 10 : i32, message = "bqk,bkd->bqd"}> : () -> ()
    %cst_34 = arith.constant dense<0.000000e+00> : vector<2x8x8xf32>
    %87 = tpu.matmul %86, %72, %cst_34 {dimension_numbers = #tpu.dot_dimension_numbers<[2], [1], [1], [2], [0, 0, 0, 1, 1, 2], [0], [0]>} : vector<2x8x8xbf16>, vector<2x8x8xbf16>, vector<2x8x8xf32> -> vector<2x8x8xf32>
    "tpu.trace_stop"() : () -> ()
    %88 = arith.truncf %87 : vector<2x8x8xf32> to vector<2x8x8xbf16>
    %89 = tpu.concatenate %31, %50, %69, %88 in 2 : vector<2x8x8xbf16>, vector<2x8x8xbf16>, vector<2x8x8xbf16>, vector<2x8x8xbf16> -> vector<2x8x32xbf16>
    %90 = vector.shape_cast %89 : vector<2x8x32xbf16> to vector<16x32xbf16>
    %c0_35 = arith.constant 0 : index
    %c0_36 = arith.constant 0 : index
    %91 = vector.load %arg4[%c0_35, %c0_36] : memref<32x32xbf16, #tpu.memory_space<vmem>>, vector<32x32xbf16>
    %cst_37 = arith.constant dense<0.000000e+00> : vector<16x32xf32>
    %92 = tpu.matmul %90, %91, %cst_37 {dimension_numbers = #tpu.dot_dimension_numbers<[1], [0], [0], [1], [0, 0, 1, 1], [], []>} : vector<16x32xbf16>, vector<32x32xbf16>, vector<16x32xf32> -> vector<16x32xf32>
    %c0_38 = arith.constant 0 : index
    %c0_39 = arith.constant 0 : index
    %93 = vector.load %arg5[%c0_38, %c0_39] : memref<1x32xf32, #tpu.memory_space<vmem>>, vector<1x32xf32>
    %94 = vector.broadcast %93 : vector<1x32xf32> to vector<16x32xf32>
    %95 = arith.addf %92, %94 : vector<16x32xf32>
    %96 = vector.shape_cast %95 : vector<16x32xf32> to vector<2x8x32xf32>
    %c0_40 = arith.constant 0 : index
    %c0_41 = arith.constant 0 : index
    %c0_42 = arith.constant 0 : index
    %97 = vector.load %arg6[%c0_40, %c0_41, %c0_42] : memref<2x8x32xf32, #tpu.memory_space<vmem>>, vector<2x8x32xf32>
    tpu.vector_store %arg6[%c0_40, %c0_41, %c0_42], %96 {strides = array<i32>} : memref<2x8x32xf32, #tpu.memory_space<vmem>>, vector<2x8x32xf32>,
    return
  }
  func.func @transform_0(%arg0: i32) -> (i32, i32, i32) {
    %c0_i32 = arith.constant 0 : i32
    %c0_i32_0 = arith.constant 0 : i32
    %c0_i32_1 = arith.constant 0 : i32
    return %arg0, %c0_i32, %c0_i32_0 : i32, i32, i32
  }
  func.func @transform_1(%arg0: i32) -> (i32, i32) {
    %c0_i32 = arith.constant 0 : i32
    %c0_i32_0 = arith.constant 0 : i32
    %c0_i32_1 = arith.constant 0 : i32
    return %c0_i32, %c0_i32_0 : i32, i32
  }
  func.func @transform_2(%arg0: i32) -> (i32, i32) {
    %c0_i32 = arith.constant 0 : i32
    %c0_i32_0 = arith.constant 0 : i32
    %c0_i32_1 = arith.constant 0 : i32
    return %c0_i32, %c0_i32_0 : i32, i32
  }
  func.func @transform_3(%arg0: i32) -> (i32, i32) {
    %c0_i32 = arith.constant 0 : i32
    %c0_i32_0 = arith.constant 0 : i32
    %c0_i32_1 = arith.constant 0 : i32
    return %c0_i32, %c0_i32_0 : i32, i32
  }
  func.func @transform_4(%arg0: i32) -> (i32, i32) {
    %c0_i32 = arith.constant 0 : i32
    %c0_i32_0 = arith.constant 0 : i32
    %c0_i32_1 = arith.constant 0 : i32
    return %c0_i32, %c0_i32_0 : i32, i32
  }
  func.func @transform_5(%arg0: i32) -> (i32, i32, i32) {
    %c0_i32 = arith.constant 0 : i32
    %c0_i32_0 = arith.constant 0 : i32
    %c0_i32_1 = arith.constant 0 : i32
    return %arg0, %c0_i32, %c0_i32_0 : i32, i32, i32
  }
  func.func @transform_6(%arg0: i32) -> (i32, i32, i32, i32) {
    %c0_i32 = arith.constant 0 : i32
    %c0_i32_0 = arith.constant 0 : i32
    %c0_i32_1 = arith.constant 0 : i32
    %c0_i32_2 = arith.constant 0 : i32
    return %arg0, %c0_i32, %c0_i32_0, %c0_i32_1 : i32, i32, i32, i32
  }
}

</mosaic_0001>

<bundles_post_ra>
// kernel: tpu_custom_call.1
= control target key start
LH: loop header
LB: loop body
LE: loop exit
PB: predicated region body
PF: predicated region fallthrough
CT: control target
= control target key end

     0   :  { %12 = vsyncpa [#allocation3], 0  ;;  %s1272_s0 = inlined_call_operand.hbm [shape: f32[2,8,32], index: 0, kind: input, shape index: {}]   ;;  %s1273_s1 = inlined_call_operand.hbm [shape: bf16[32,96], index: 1, kind: input, shape index: {}]   ;;  %s1274_s2 = inlined_call_operand.vmem [shape: f32[1,96], index: 2, kind: input, shape index: {}]   ;;  %s1275_s3 = inlined_call_operand.hbm [shape: bf16[32,32], index: 3, kind: input, shape index: {}]   ;;  %s1276_s4 = inlined_call_operand.vmem [shape: f32[1,32], index: 4, kind: input, shape index: {}]   ;;  %s1277_s5 = inlined_call_operand.hbm [shape: f32[2,8,32], index: 5, kind: output, shape index: {0}]   ;;  %s1278_s6 = inlined_call_operand.hbm [shape: f32[2,4,8,8], index: 6, kind: output, shape index: {1}]  }
   0x1   :  { %13 = vsyncpa [#allocation6], 0 }
   0x2   :  { %14 = vsyncpa [#allocation4], 0  ;;  %s33_s23 = sshll.u32 %s1273_s1, 4  ;;  %s34_s23 = int_to_ptr.hbm [resolvable:$true] %s33_s23 }
   0x3   :  { %15 = vsyncpa [#allocation10], 0  ;;  %s1039_s24 = smov [#allocation5]   ;;  %s20_s28 = sshll.u32 %s1272_s0, 4  ;;  %s21_s28 = int_to_ptr.hbm [resolvable:$true] %s20_s28 }
   0x4   :  { %s35_s25 = sshll.u32 %s1039_s24, 4  ;;  %s1040_s29 = smov 64   ;;  %s36_s25 = int_to_ptr.vmem [resolvable:$true] %s35_s25 }
   0x5   :  { %s1041_s30 = smov 4   ;;  %s1042_s7 = smov [#allocation2]  }
   0x6   :  { %41 = dma.hbm_to_vmem [thread:$0]  %s34_s23, 256, %s36_s25, [#allocation6], %s1040_s29, %s1040_s29, %s1041_s30  }
   0x7   :  { %s22_s8 = sshll.u32 %s1042_s7, 4  ;;  %s1043_s9 = smov 128   ;;  %s23_s8 = int_to_ptr.vmem [resolvable:$true] %s22_s8 }
   0x8   :  { %s1044_s1 = smov 8   ;;  %s48_s12 = sshll.u32 %s1275_s3, 4  ;;  %s49_s12 = int_to_ptr.hbm [resolvable:$true] %s48_s12 }
   0x9   :  { %28 = dma.hbm_to_vmem [thread:$0]  %s21_s28, 256, %s23_s8, [#allocation3], %s1043_s9, %s1043_s9, %s1044_s1  }
   0xa   :  { %s1045_s0 = smov [#allocation7]  }
   0xb   :  { %s50_s13 = sshll.u32 %s1045_s0, 4  ;;  %s51_s13 = int_to_ptr.vmem [resolvable:$true] %s50_s13 }
   0xc   :  { %56 = dma.hbm_to_vmem [thread:$0]  %s49_s12, 256, %s51_s13, [#allocation6], %s1040_s29, %s1040_s29, %s1041_s30  }
   0xd   :  { %1031 = dma.done.wait [#allocation3], 256  }
   0xe   :  { %1032 = vsyncadd [#allocation3], 4294967040 }
   0xf   :  { %1033 = dma.done.wait [#allocation6], 512  }
  0x10   :  { %1034 = vsyncadd [#allocation6], 4294966784  ;;  %v853_v0 = vld [vmem:[#allocation5 + $0x8] sm:$0xff]  ;;  %v852_v1 = vld [vmem:[#allocation5] sm:$0xff]  ;;  %vm95_vm0 = vcmask 261120   ;;  %s1046_s15 = smov 120  }
  0x11   :  { %105 = vmatpush.bf16.msra.mxu0 %v853_v0  ;;  %v72_v2 = vld [vmem:[#allocation2] sm:$0xff]  ;;  %v73_v3 = vld [vmem:[#allocation2 + $0x8] sm:$0xff]  ;;  %s1047_s16 = smov 88   ;;  %s1048_s17 = smov 96   ;;  %vm120_vm1 = vcmask 64512   ;;  %vm221_vm2 = vcmask 1043456  }
  0x12   :  { %v74_v4 = vpack.c.bf16 %v73_v3, %v72_v2  ;;  %v877_v5 = vld [vmem:[%s1274_s2] ss:$0 sm:$0xff]  ;;  %s1049_s2 = smov 112   ;;  %s1050_s18 = smov 80  }
  0x13   :  { %s1051_s19 = smov 72   ;;  %s1052_s20 = smov 104  }
  0x14   :  { %s1053_s21 = smov 56   ;;  %s1054_s22 = smov 40  }
  0x15   :  { %106 = vmatpush.bf16.msra.mxu0 %v852_v1  ;;  %s1055_s23 = smov 48   ;;  %s1056_s24 = smov 16  }
  0x16   :  { %s1057_s25 = smov 24   ;;  %s1058_s26 = smov [#allocation9]  }
  0x17   :  { %s797_s27 = sshll.u32 %s1058_s26, 4  ;;  %s799_s30 = sshll.u32 %s1278_s6, 4  ;;  %s798_s27 = int_to_ptr.vmem [resolvable:$true] %s797_s27  ;;  %s800_s30 = int_to_ptr.hbm [resolvable:$true] %s799_s30 }
  0x18   :  { %826 = vmatmul.msk.bf16.vlgmr.msra.gmra.mxu0 %vm95_vm0, %v74_v4  ;;  %s1059_s10 = smov [#allocation8]   ;;  %s786_s6 = sshll.u32 %s1277_s5, 4  ;;  %s787_s6 = int_to_ptr.hbm [resolvable:$true] %s786_s6 }
  0x19   :  { %s784_s11 = sshll.u32 %s1059_s10, 4  ;;  %s785_s11 = int_to_ptr.vmem [resolvable:$true] %s784_s11 }
  0x95   :  { %v108_v6 = vpop.f32.mrf.mxu0 }
  0x96   :  { %v109_v7 = vadd.f32 %v877_v5, %v108_v6 }
  0x98   :  { %v113_v8 = vpack.c.bf16 %v109_v7, %v109_v7 }
  0x9a   :  { %v116_v9 = vunpack.c.l.b16 %v113_v8 }
  0x9c   :  { %v1115_v10 = vpack.c.b16 %v116_v9, %v116_v9 }
  0x9d   :  { %v110_v11 = vpop.f32.mrf.mxu0 }
  0x9e   :  { %v111_v12 = vadd.f32 %v877_v5, %v110_v11  ;;  %261 = vrot.lane.b32.xlu2 %v1115_v10, %s1046_s15  ;;  %263 = vrot.lane.b32.xlu1 %v1115_v10, %s1047_s16 }
  0x9f   :  { %118 = vrot.lane.b32.xlu0 %v1115_v10, %s1048_s17 }
  0xa0   :  { %v114_v13 = vpack.c.bf16 %v111_v12, %v111_v12 }
  0xa2   :  { %v141_v14 = vunpack.c.l.b16 %v114_v13 }
  0xa4   :  { %v1120_v15 = vpack.c.b16 %v141_v14, %v141_v14 }
  0xa6   :  { %284 = vrot.lane.b32.xlu2 %v1120_v15, %s1046_s15  ;;  %286 = vrot.lane.b32.xlu1 %v1120_v15, %s1047_s16 }
  0xa7   :  { %143 = vrot.lane.b32.xlu0 %v1120_v15, %s1048_s17 }
  0xae   :  { %404 = vrot.lane.b32.xlu2 %v1115_v10, %s1049_s2  ;;  %429 = vrot.lane.b32.xlu1 %v1120_v15, %s1050_s18 }
  0xaf   :  { %406 = vrot.lane.b32.xlu0 %v1115_v10, %s1050_s18 }
  0xb6   :  { %572 = vrot.lane.b32.xlu2 %v1120_v15, %s1051_s19  ;;  %549 = vrot.lane.b32.xlu1 %v1115_v10, %s1051_s19 }
  0xb7   :  { %427 = vrot.lane.b32.xlu0 %v1120_v15, %s1049_s2 }
  0xbe   :  { %570 = vrot.lane.b32.xlu1 %v1120_v15, %s1052_s20 }
  0xbf   :  { %547 = vrot.lane.b32.xlu0 %v1115_v10, %s1052_s20 }
  0xf8   :  { %v262_v16 = vpop.permute.xlu2 %261 }
 0x100   :  { %v285_v21 = vpop.permute.xlu2 %284 }
 0x108   :  { %v405_v26 = vpop.permute.xlu2 %404 }
 0x110   :  { %v264_v17 = vpop.permute.xlu1 %263  ;;  %v573_v31 = vpop.permute.xlu2 %572 }
 0x111   :  { %v119_v18 = vpop.permute.xlu0 %118  ;;  %v269_v19 = vsel %vm120_vm1, %v264_v17, 0  ;;  %v578_v34 = vsel %vm120_vm1, %v573_v31, 0 }
 0x112   :  { %v125_v20 = vsel %vm120_vm1, %v119_v18, 0  ;;  %278 = vmatpush.bf16.xpose.msrb.mxu0 %v269_v19 }
 0x113   :  { %134 = vmatpush.bf16.xpose.msra.mxu1 %v125_v20 }
 0x118   :  { %v287_v22 = vpop.permute.xlu1 %286 }
 0x119   :  { %v144_v23 = vpop.permute.xlu0 %143  ;;  %831 = vmatmul.msk.bf16.vlgmr.msrb.gmra.mxu0 %vm120_vm1, %v262_v16  ;;  %v292_v24 = vsel %vm120_vm1, %v287_v22, 0 }
 0x11a   :  { %827 = vmatmul.msk.bf16.vlgmr.msra.gmra.mxu1 %vm120_vm1, %v113_v8  ;;  %v149_v25 = vsel %vm120_vm1, %v144_v23, 0 }
 0x11b   :  { %158 = vmatpush.bf16.xpose.msra.mxu2 %v149_v25  ;;  %301 = vmatpush.bf16.xpose.msrb.mxu1 %v292_v24 }
 0x120   :  { %v430_v27 = vpop.permute.xlu1 %429 }
 0x121   :  { %v435_v28 = vsel %vm120_vm1, %v430_v27, 0  ;;  %v407_v29 = vpop.permute.xlu0 %406 }
 0x122   :  { %v412_v30 = vsel %vm120_vm1, %v407_v29, 0  ;;  %828 = vmatmul.msk.bf16.vlgmr.msra.gmra.mxu2 %vm120_vm1, %v114_v13 }
 0x123   :  { %444 = vmatpush.bf16.xpose.msra.mxu1 %v435_v28  ;;  %421 = vmatpush.bf16.xpose.msra.mxu0 %v412_v30 }
 0x128   :  { %v550_v32 = vpop.permute.xlu1 %549 }
 0x129   :  { %v555_v33 = vsel %vm120_vm1, %v550_v32, 0  ;;  %v428_v35 = vpop.permute.xlu0 %427 }
 0x12a   :  { %832 = vmatmul.msk.bf16.vlgmr.msrb.gmra.mxu1 %vm120_vm1, %v285_v21  ;;  %835 = vmatmul.msk.bf16.vlgmr.msra.gmra.mxu0 %vm120_vm1, %v405_v26 }
 0x12b   :  { %587 = vmatpush.bf16.xpose.msrb.mxu1 %v578_v34  ;;  %564 = vmatpush.bf16.xpose.msrb.mxu0 %v555_v33 }
 0x130   :  { %v571_v37 = vpop.permute.xlu1 %570 }
 0x131   :  { %v548_v36 = vpop.permute.xlu0 %547 }
 0x13a   :  { %836 = vmatmul.msk.bf16.vlgmr.msra.gmra.mxu1 %vm120_vm1, %v428_v35  ;;  %839 = vmatmul.msk.bf16.vlgmr.msrb.gmra.mxu0 %vm120_vm1, %v548_v36 }
 0x14a   :  { %840 = vmatmul.msk.bf16.vlgmr.msrb.gmra.mxu1 %vm120_vm1, %v571_v37 }
 0x196   :  { %v280_v38 = vpop.f32.mrf.mxu0 }
 0x197   :  { %v136_v39 = vpop.f32.mrf.mxu1  ;;  %v307_v40 = vsel %vm120_vm1, %v280_v38, -inf }
 0x198   :  { %308 = vmax.xlane.f32.xlu1 %v307_v40  ;;  %v164_v41 = vsel %vm120_vm1, %v136_v39, -inf }
 0x199   :  { %165 = vmax.xlane.f32.xlu2 %v164_v41 }
 0x19e   :  { %v282_v42 = vpop.f32.mrf.mxu0 }
 0x19f   :  { %v138_v43 = vpop.f32.mrf.mxu1 }
 0x1a5   :  { %v160_v44 = vpop.f32.mrf.mxu2 }
 0x1a6   :  { %v167_v45 = vsel %vm120_vm1, %v160_v44, -inf }
 0x1a7   :  { %v303_v46 = vpop.f32.mrf.mxu1  ;;  %168 = vmax.xlane.f32.xlu0 %v167_v45  ;;  %v1152_v47 = vpop.f32.mrf.mxu0 }
 0x1a8   :  { %v310_v48 = vsel %vm120_vm1, %v303_v46, -inf  ;;  %v450_v60 = vsel %vm120_vm1, %v1152_v47, -inf }
 0x1a9   :  { %311 = vmax.xlane.f32.xlu2 %v310_v48 }
 0x1ad   :  { %v162_v49 = vpop.f32.mrf.mxu2 }
 0x1af   :  { %v305_v50 = vpop.f32.mrf.mxu1  ;;  %v425_v51 = vpop.f32.mrf.mxu0 }
 0x1b1   :  { %381 = vrot.lane.b32.xlu1 %v1120_v15, %s1053_s21 }
 0x1b7   :  { %v1156_v52 = vpop.f32.mrf.mxu1  ;;  %v1158_v53 = vpop.f32.mrf.mxu0 }
 0x1b8   :  { %v453_v54 = vsel %vm120_vm1, %v1156_v52, -inf  ;;  %v593_v61 = vsel %vm120_vm1, %v1158_v53, -inf }
 0x1b9   :  { %454 = vmax.xlane.f32.xlu0 %v453_v54 }
 0x1bf   :  { %v448_v55 = vpop.f32.mrf.mxu1  ;;  %v568_v56 = vpop.f32.mrf.mxu0 }
 0x1c1   :  { %216 = vrot.lane.b32.xlu2 %v1115_v10, %s1040_s29 }
 0x1c7   :  { %v589_v57 = vpop.f32.mrf.mxu1 }
 0x1c8   :  { %v596_v58 = vsel %vm120_vm1, %v589_v57, -inf }
 0x1c9   :  { %597 = vmax.xlane.f32.xlu0 %v596_v58 }
 0x1cf   :  { %v591_v59 = vpop.f32.mrf.mxu1 }
 0x1dd   :  { %238 = vrot.lane.b32.xlu0 %v1120_v15, %s1040_s29 }
 0x1ea   :  { %451 = vmax.xlane.f32.xlu2 %v450_v60 }
 0x1f2   :  { %594 = vmax.xlane.f32.xlu2 %v593_v61 }
 0x20a   :  { %360 = vrot.lane.b32.xlu2 %v1115_v10, %s1053_s21 }
 0x20b   :  { %v309_v62 = vpop.xlane.xlu1 %308 }
 0x20c   :  { %v313_v63 = vsub.f32 %v280_v38, %v309_v62  ;;  %v166_v0 = vpop.xlane.xlu2 %165 }
 0x20d   :  { %v170_v1 = vsub.f32 %v136_v39, %v166_v0 }
 0x20e   :  { %v315_v2 = vmul.f32 1.442695, %v313_v63 }
 0x20f   :  { %v172_v3 = vmul.f32 1.442695, %v170_v1 }
 0x210   :  { %879 = vpow2.f32 %v315_v2 }
 0x211   :  { %881 = vpow2.f32 %v172_v3 }
 0x216   :  { %v1172_v4 = vpop.eup %879 }
 0x217   :  { %v1174_v5 = vpop.eup %881  ;;  %v319_v6 = vsel %vm120_vm1, %v1172_v4, 0.0 }
 0x218   :  { %v176_v7 = vsel %vm120_vm1, %v1174_v5, 0.0  ;;  %320 = vadd.xlane.f32.xlu0 %v319_v6 }
 0x219   :  { %177 = vadd.xlane.f32.xlu1 %v176_v7 }
 0x21a   :  { %v169_v8 = vpop.xlane.xlu0 %168 }
 0x21b   :  { %v171_v9 = vsub.f32 %v160_v44, %v169_v8 }
 0x21c   :  { %v312_v11 = vpop.xlane.xlu2 %311 }
 0x21d   :  { %v174_v12 = vmul.f32 1.442695, %v171_v9  ;;  %v314_v13 = vsub.f32 %v303_v46, %v312_v11 }
 0x21f   :  { %883 = vpow2.f32 %v174_v12  ;;  %v317_v14 = vmul.f32 1.442695, %v314_v13 }
 0x221   :  { %885 = vpow2.f32 %v317_v14 }
 0x223   :  { %v382_v46 = vpop.permute.xlu1 %381 }
 0x224   :  { %v217_v16 = vpop.permute.xlu2 %216  ;;  %v387_v13 = vsel %vm221_vm2, %v382_v46, 0 }
 0x225   :  { %v1180_v17 = vpop.eup %883  ;;  %v223_v18 = vsel %vm221_vm2, %v217_v16, 0 }
 0x226   :  { %232 = vmatpush.bf16.msra.mxu3 %v223_v18  ;;  %v179_v19 = vsel %vm120_vm1, %v1180_v17, 0.0 }
 0x227   :  { %180 = vadd.xlane.f32.xlu1 %v179_v19  ;;  %v1185_v20 = vpop.eup %885 }
 0x228   :  { %v322_v21 = vsel %vm120_vm1, %v1185_v20, 0.0 }
 0x22c   :  { %v455_v22 = vpop.xlane.xlu0 %454 }
 0x22d   :  { %v457_v32 = vsub.f32 %v1156_v52, %v455_v22 }
 0x22f   :  { %323 = vadd.xlane.f32.xlu1 %v322_v21  ;;  %v460_v34 = vmul.f32 1.442695, %v457_v32 }
 0x23c   :  { %v598_v23 = vpop.xlane.xlu0 %597 }
 0x23d   :  { %v600_v24 = vsub.f32 %v589_v57, %v598_v23 }
 0x23f   :  { %v603_v25 = vmul.f32 1.442695, %v600_v24 }
 0x241   :  { %887 = vpow2.f32 %v603_v25 }
 0x247   :  { %v1189_v26 = vpop.eup %887 }
 0x248   :  { %v608_v27 = vsel %vm120_vm1, %v1189_v26, 0.0 }
 0x249   :  { %609 = vadd.xlane.f32.xlu2 %v608_v27 }
 0x24f   :  { %v239_v28 = vpop.permute.xlu0 %238 }
 0x250   :  { %v244_v29 = vsel %vm221_vm2, %v239_v28, 0 }
 0x251   :  { %253 = vmatpush.bf16.msrb.mxu3 %v244_v29 }
 0x25d   :  { %v452_v30 = vpop.xlane.xlu2 %451 }
 0x25e   :  { %v456_v31 = vsub.f32 %v1152_v47, %v452_v30 }
 0x260   :  { %v458_v33 = vmul.f32 1.442695, %v456_v31 }
 0x262   :  { %889 = vpow2.f32 %v458_v33 }
 0x263   :  { %891 = vpow2.f32 %v460_v34 }
 0x265   :  { %v595_v35 = vpop.xlane.xlu2 %594 }
 0x266   :  { %v599_v36 = vsub.f32 %v1158_v53, %v595_v35 }
 0x268   :  { %v1197_v37 = vpop.eup %889  ;;  %v601_v38 = vmul.f32 1.442695, %v599_v36 }
 0x269   :  { %v462_v39 = vsel %vm120_vm1, %v1197_v37, 0.0  ;;  %v1201_v41 = vpop.eup %891 }
 0x26a   :  { %893 = vpow2.f32 %v601_v38  ;;  %463 = vadd.xlane.f32.xlu1 %v462_v39  ;;  %v465_v45 = vsel %vm120_vm1, %v1201_v41, 0.0 }
 0x26d   :  { %v361_v40 = vpop.permute.xlu2 %360 }
 0x26e   :  { %v366_v42 = vsel %vm221_vm2, %v361_v40, 0 }
 0x26f   :  { %375 = vmatpush.bf16.msrb.mxu2 %v366_v42 }
 0x270   :  { %v1204_v43 = vpop.eup %893 }
 0x271   :  { %v605_v44 = vsel %vm120_vm1, %v1204_v43, 0.0 }
 0x272   :  { %606 = vadd.xlane.f32.xlu0 %v605_v44  ;;  %466 = vadd.xlane.f32.xlu1 %v465_v45 }
 0x286   :  { %667 = vrot.lane.b32.xlu0 %v1120_v15, %s1054_s22 }
 0x28b   :  { %503 = vrot.lane.b32.xlu1 %v1115_v10, %s1055_s23  ;;  %v321_v47 = vpop.xlane.xlu0 %320 }
 0x28c   :  { %v178_v48 = vpop.xlane.xlu1 %177  ;;  %895 = vrcp.f32 %v321_v47  ;;  %v336_v55 = vand.u32 2147483648, %v321_v47  ;;  %v334_v58 = vand.u32 2147483647, %v321_v47  ;;  %vm330_vm5 = vweird.f32 %v321_v47 }
 0x28d   :  { %897 = vrcp.f32 %v178_v48  ;;  %v193_v56 = vand.u32 2147483648, %v178_v48  ;;  %v191_v60 = vand.u32 2147483647, %v178_v48  ;;  %vm187_vm6 = vweird.f32 %v178_v48 }
 0x28e   :  { %v337_v63 = vor.u32 1.1754944e-38, %v336_v55  ;;  %vm335_vm9 = vcmp.eq.f32.partialorder %v334_v58, 8.507059e+37 }
 0x28f   :  { %vm192_vm10 = vcmp.eq.f32.partialorder %v191_v60, 8.507059e+37 }
 0x292   :  { %v896_v49 = vpop.eup %895 }
 0x293   :  { %v898_v50 = vpop.eup %897  ;;  %v326_v51 = vmul.f32 %v896_v49, %v321_v47  ;;  %524 = vrot.lane.b32.xlu1 %v1120_v15, %s1055_s23  ;;  %vm331_vm3 = vweird.f32 %v896_v49  ;;  %v194_v15 = vor.u32 1.1754944e-38, %v193_v56 }
 0x294   :  { %v183_v52 = vmul.f32 %v898_v50, %v178_v48  ;;  %vm188_vm4 = vweird.f32 %v898_v50  ;;  %vm332_vm7 = vmor %vm330_vm5, %vm331_vm3 }
 0x295   :  { %v327_v53 = vsub.f32 1.0, %v326_v51  ;;  %vm189_vm8 = vmor %vm187_vm6, %vm188_vm4 }
 0x296   :  { %v184_v54 = vsub.f32 1.0, %v183_v52 }
 0x297   :  { %v328_v57 = vmul.f32 %v896_v49, %v327_v53 }
 0x298   :  { %v185_v59 = vmul.f32 %v898_v50, %v184_v54 }
 0x299   :  { %v329_v61 = vadd.f32 %v896_v49, %v328_v57 }
 0x29a   :  { %v186_v62 = vadd.f32 %v898_v50, %v185_v59  ;;  %v181_v0 = vpop.xlane.xlu1 %180 }
 0x29b   :  { %v333_v1 = vsel %vm332_vm7, %v896_v49, %v329_v61  ;;  %899 = vrcp.f32 %v181_v0  ;;  %646 = vrot.lane.b32.xlu1 %v1115_v10, %s1054_s22  ;;  %v208_v16 = vand.u32 2147483648, %v181_v0  ;;  %v206_v18 = vand.u32 2147483647, %v181_v0 }
 0x29c   :  { %v190_v2 = vsel %vm189_vm8, %v898_v50, %v186_v62  ;;  %v338_v3 = vsel %vm335_vm9, %v337_v63, %v333_v1  ;;  %vm202_vm12 = vweird.f32 %v181_v0 }
 0x29d   :  { %v195_v6 = vsel %vm192_vm10, %v194_v15, %v190_v2  ;;  %v339_v7 = vmul.f32 %v1172_v4, %v338_v3  ;;  %v209_v22 = vor.u32 1.1754944e-38, %v208_v16  ;;  %vm207_vm14 = vcmp.eq.f32.partialorder %v206_v18, 8.507059e+37 }
 0x29e   :  { %v196_v8 = vmul.f32 %v1174_v5, %v195_v6 }
 0x29f   :  { %356 = vst.msk [vmem:[#allocation9 + $0x8] sm:$0xff] %vm120_vm1, %v339_v7  ;;  %v358_v9 = vpack.c.bf16 %v339_v7, %v339_v7 }
 0x2a0   :  { %212 = vst.msk [vmem:[#allocation9] sm:$0xff] %vm120_vm1, %v196_v8  ;;  %v214_v11 = vpack.c.bf16 %v196_v8, %v196_v8 }
 0x2a1   :  { %v900_v12 = vpop.eup %899  ;;  %833 = vmatmul.msk.bf16.vlgmr.msrb.gmra.mxu2 %vm120_vm1, %v358_v9 }
 0x2a2   :  { %v198_v10 = vmul.f32 %v900_v12, %v181_v0  ;;  %829 = vmatmul.msk.bf16.vlgmr.msra.gmra.mxu3 %vm120_vm1, %v214_v11  ;;  %v324_v14 = vpop.xlane.xlu1 %323  ;;  %vm203_vm11 = vweird.f32 %v900_v12 }
 0x2a3   :  { %901 = vrcp.f32 %v324_v14  ;;  %396 = vmatpush.bf16.msra.mxu3 %v387_v13  ;;  %vm204_vm13 = vmor %vm202_vm12, %vm203_vm11  ;;  %v351_v29 = vand.u32 2147483648, %v324_v14  ;;  %v349_v31 = vand.u32 2147483647, %v324_v14  ;;  %vm345_vm3 = vweird.f32 %v324_v14 }
 0x2a4   :  { %v199_v4 = vsub.f32 1.0, %v198_v10 }
 0x2a5   :  { %v352_v34 = vor.u32 1.1754944e-38, %v351_v29  ;;  %vm350_vm5 = vcmp.eq.f32.partialorder %v349_v31, 8.507059e+37 }
 0x2a6   :  { %v200_v5 = vmul.f32 %v900_v12, %v199_v4 }
 0x2a8   :  { %v201_v19 = vadd.f32 %v900_v12, %v200_v5 }
 0x2a9   :  { %v902_v21 = vpop.eup %901 }
 0x2aa   :  { %v205_v23 = vsel %vm204_vm13, %v900_v12, %v201_v19  ;;  %v341_v24 = vmul.f32 %v902_v21, %v324_v14  ;;  %vm346_vm15 = vweird.f32 %v902_v21 }
 0x2ab   :  { %v210_v25 = vsel %vm207_vm14, %v209_v22, %v205_v23  ;;  %vm347_vm4 = vmor %vm345_vm3, %vm346_vm15 }
 0x2ac   :  { %v342_v27 = vsub.f32 1.0, %v341_v24  ;;  %v211_v28 = vmul.f32 %v1180_v17, %v210_v25 }
 0x2ae   :  { %v343_v30 = vmul.f32 %v902_v21, %v342_v27  ;;  %213 = vst.msk [vmem:[#allocation9 + $0x20] sm:$0xff] %vm120_vm1, %v211_v28  ;;  %v215_v33 = vpack.c.bf16 %v211_v28, %v211_v28 }
 0x2b0   :  { %v344_v32 = vadd.f32 %v902_v21, %v343_v30 }
 0x2b2   :  { %v348_v35 = vsel %vm347_vm4, %v902_v21, %v344_v32  ;;  %830 = vmatmul.msk.bf16.vlgmr.msrb.gmra.mxu3 %vm120_vm1, %v215_v33 }
 0x2b3   :  { %v353_v36 = vsel %vm350_vm5, %v352_v34, %v348_v35 }
 0x2b4   :  { %v354_v38 = vmul.f32 %v1185_v20, %v353_v36 }
 0x2b6   :  { %357 = vst.msk [vmem:[#allocation9 + $0x28] sm:$0xff] %vm120_vm1, %v354_v38  ;;  %v359_v39 = vpack.c.bf16 %v354_v38, %v354_v38 }
 0x2bc   :  { %v610_v17 = vpop.xlane.xlu2 %609 }
 0x2bd   :  { %903 = vrcp.f32 %v610_v17  ;;  %v637_v45 = vand.u32 2147483648, %v610_v17  ;;  %v635_v47 = vand.u32 2147483647, %v610_v17  ;;  %vm631_vm7 = vweird.f32 %v610_v17 }
 0x2bf   :  { %v638_v49 = vor.u32 1.1754944e-38, %v637_v45  ;;  %vm636_vm9 = vcmp.eq.f32.partialorder %v635_v47, 8.507059e+37 }
 0x2c2   :  { %834 = vmatmul.msk.bf16.vlgmr.msra.gmra.mxu3 %vm120_vm1, %v359_v39 }
 0x2c3   :  { %v904_v40 = vpop.eup %903 }
 0x2c4   :  { %v627_v42 = vmul.f32 %v904_v40, %v610_v17  ;;  %vm632_vm6 = vweird.f32 %v904_v40 }
 0x2c5   :  { %vm633_vm8 = vmor %vm631_vm7, %vm632_vm6 }
 0x2c6   :  { %v628_v44 = vsub.f32 1.0, %v627_v42 }
 0x2c8   :  { %v629_v46 = vmul.f32 %v904_v40, %v628_v44 }
 0x2ca   :  { %v630_v48 = vadd.f32 %v904_v40, %v629_v46 }
 0x2cc   :  { %v634_v50 = vsel %vm633_vm8, %v904_v40, %v630_v48 }
 0x2cd   :  { %v639_v20 = vsel %vm636_vm9, %v638_v49, %v634_v50  ;;  %vm731_vm9 = vcmask 195584  }
 0x2ce   :  { %v1230_v51 = vmul.f32 %v1189_v26, %v639_v20 }
 0x2d0   :  { %643 = vst.msk [vmem:[#allocation9 + $0x38] sm:$0xff] %vm120_vm1, %v1230_v51  ;;  %v645_v34 = vpack.c.bf16 %v1230_v51, %v1230_v51 }
 0x2dd   :  { %v464_v52 = vpop.xlane.xlu1 %463 }
 0x2de   :  { %905 = vrcp.f32 %v464_v52  ;;  %v479_v58 = vand.u32 2147483648, %v464_v52  ;;  %v477_v60 = vand.u32 2147483647, %v464_v52  ;;  %vm473_vm11 = vweird.f32 %v464_v52 }
 0x2e0   :  { %v480_v62 = vor.u32 1.1754944e-38, %v479_v58  ;;  %vm478_vm13 = vcmp.eq.f32.partialorder %v477_v60, 8.507059e+37 }
 0x2e4   :  { %v906_v53 = vpop.eup %905 }
 0x2e5   :  { %v469_v54 = vmul.f32 %v906_v53, %v464_v52  ;;  %v467_v55 = vpop.xlane.xlu1 %466  ;;  %v607_v56 = vpop.xlane.xlu0 %606  ;;  %vm474_vm10 = vweird.f32 %v906_v53 }
 0x2e6   :  { %907 = vrcp.f32 %v467_v55  ;;  %vm475_vm12 = vmor %vm473_vm11, %vm474_vm10  ;;  %v494_v7 = vand.u32 2147483648, %v467_v55  ;;  %v492_v11 = vand.u32 2147483647, %v467_v55  ;;  %v622_v12 = vand.u32 2147483648, %v607_v56 }
 0x2e7   :  { %v470_v57 = vsub.f32 1.0, %v469_v54  ;;  %909 = vrcp.f32 %v607_v56  ;;  %v620_v10 = vand.u32 2147483647, %v607_v56  ;;  %vm488_vm3 = vweird.f32 %v467_v55 }
 0x2e8   :  { %v495_v4 = vor.u32 1.1754944e-38, %v494_v7  ;;  %vm616_vm5 = vweird.f32 %v607_v56  ;;  %vm493_vm6 = vcmp.eq.f32.partialorder %v492_v11, 8.507059e+37  ;;  %v854_v7 = vld [vmem:[#allocation7] sm:$0xff] }
 0x2e9   :  { %v471_v59 = vmul.f32 %v906_v53, %v470_v57  ;;  %vm621_vm8 = vcmp.eq.f32.partialorder %v620_v10, 8.507059e+37 }
 0x2eb   :  { %v472_v61 = vadd.f32 %v906_v53, %v471_v59 }
 0x2ec   :  { %v908_v26 = vpop.eup %907 }
 0x2ed   :  { %v910_v63 = vpop.eup %909  ;;  %v476_v0 = vsel %vm475_vm12, %v906_v53, %v472_v61  ;;  %v484_v15 = vmul.f32 %v908_v26, %v467_v55  ;;  %vm489_vm14 = vweird.f32 %v908_v26 }
 0x2ee   :  { %v481_v1 = vsel %vm478_vm13, %v480_v62, %v476_v0  ;;  %v612_v2 = vmul.f32 %v910_v63, %v607_v56  ;;  %vm617_vm15 = vweird.f32 %v910_v63  ;;  %vm490_vm4 = vmor %vm488_vm3, %vm489_vm14 }
 0x2ef   :  { %v482_v3 = vmul.f32 %v1197_v37, %v481_v1  ;;  %v485_v6 = vsub.f32 1.0, %v484_v15  ;;  %vm618_vm7 = vmor %vm616_vm5, %vm617_vm15  ;;  %v623_v37 = vor.u32 1.1754944e-38, %v622_v12 }
 0x2f0   :  { %v613_v8 = vsub.f32 1.0, %v612_v2 }
 0x2f1   :  { %499 = vst.msk [vmem:[#allocation9 + $0x10] sm:$0xff] %vm120_vm1, %v482_v3  ;;  %v486_v9 = vmul.f32 %v908_v26, %v485_v6  ;;  %v501_v27 = vpack.c.bf16 %v482_v3, %v482_v3  ;;  %v855_v6 = vld [vmem:[#allocation7 + $0x8] sm:$0xff] }
 0x2f2   :  { %v614_v13 = vmul.f32 %v910_v63, %v613_v8  ;;  %770 = vmatpush.bf16.msra.mxu0 %v855_v6 }
 0x2f3   :  { %v487_v14 = vadd.f32 %v908_v26, %v486_v9 }
 0x2f4   :  { %v615_v16 = vadd.f32 %v910_v63, %v614_v13 }
 0x2f5   :  { %v491_v5 = vsel %vm490_vm4, %v908_v26, %v487_v14 }
 0x2f6   :  { %v496_v18 = vsel %vm493_vm6, %v495_v4, %v491_v5  ;;  %v619_v19 = vsel %vm618_vm7, %v910_v63, %v615_v16  ;;  %771 = vmatpush.bf16.msra.mxu0 %v854_v7 }
 0x2f7   :  { %v497_v21 = vmul.f32 %v1201_v41, %v496_v18  ;;  %v624_v22 = vsel %vm621_vm8, %v623_v37, %v619_v19 }
 0x2f8   :  { %v625_v23 = vmul.f32 %v1204_v43, %v624_v22  ;;  %v668_v28 = vpop.permute.xlu0 %667 }
 0x2f9   :  { %500 = vst.msk [vmem:[#allocation9 + $0x30] sm:$0xff] %vm120_vm1, %v497_v21  ;;  %v673_v41 = vsel %vm221_vm2, %v668_v28, 0  ;;  %v502_v43 = vpack.c.bf16 %v497_v21, %v497_v21 }
 0x2fa   :  { %642 = vst.msk [vmem:[#allocation9 + $0x18] sm:$0xff] %vm120_vm1, %v625_v23  ;;  %v644_v33 = vpack.c.bf16 %v625_v23, %v625_v23 }
 0x2fb   :  { %805 = dma.vmem_to_hbm [thread:$0]  %s798_s27, 1024, %s800_s30, [#allocation10], %s1043_s9, %s1043_s9, %s1044_s1  }
 0x2fd   :  { %v504_v24 = vpop.permute.xlu1 %503 }
 0x2fe   :  { %v509_v25 = vsel %vm221_vm2, %v504_v24, 0 }
 0x2ff   :  { %518 = vmatpush.bf16.msra.mxu2 %v509_v25  ;;  %v878_v25 = vld [vmem:[%s1276_s4] ss:$0 sm:$0xff] }
 0x302   :  { %837 = vmatmul.msk.bf16.vlgmr.msra.gmra.mxu2 %vm120_vm1, %v501_v27 }
 0x305   :  { %v525_v29 = vpop.permute.xlu1 %524 }
 0x306   :  { %v530_v30 = vsel %vm221_vm2, %v525_v29, 0 }
 0x307   :  { %539 = vmatpush.bf16.msrb.mxu3 %v530_v30 }
 0x30a   :  { %838 = vmatmul.msk.bf16.vlgmr.msrb.gmra.mxu3 %vm120_vm1, %v502_v43 }
 0x30b   :  { %682 = vmatpush.bf16.msra.mxu3 %v673_v41 }
 0x30d   :  { %v647_v31 = vpop.permute.xlu1 %646 }
 0x30e   :  { %v652_v32 = vsel %vm221_vm2, %v647_v31, 0  ;;  %vm726_vm2 = vcmask 130048  }
 0x30f   :  { %661 = vmatpush.bf16.msrb.mxu2 %v652_v32 }
 0x312   :  { %841 = vmatmul.msk.bf16.vlgmr.msrb.gmra.mxu2 %vm120_vm1, %v644_v33 }
 0x31a   :  { %842 = vmatmul.msk.bf16.vlgmr.msra.gmra.mxu3 %vm120_vm1, %v645_v34 }
 0x324   :  { %v377_v35 = vpop.f32.mrf.mxu2 }
 0x325   :  { %v234_v36 = vpop.f32.mrf.mxu3  ;;  %v402_v38 = vpack.c.bf16 %v377_v35, %v377_v35 }
 0x326   :  { %v259_v12 = vpack.c.bf16 %v234_v36, %v234_v36 }
 0x327   :  { %v692_v17 = vunpack.c.l.b16 %v402_v38 }
 0x329   :  { %v694_v39 = vpack.c.b16 %v692_v17, %v692_v17 }
 0x32b   :  { %696 = vrot.lane.b32.xlu2 %v694_v39, %s1044_s1 }
 0x32c   :  { %v379_v40 = vpop.f32.mrf.mxu2 }
 0x32d   :  { %v236_v42 = vpop.f32.mrf.mxu3 }
 0x335   :  { %v255_v44 = vpop.f32.mrf.mxu3 }
 0x336   :  { %v260_v13 = vpack.c.bf16 %v255_v44, %v255_v44 }
 0x33d   :  { %v257_v45 = vpop.f32.mrf.mxu3 }
 0x345   :  { %v398_v46 = vpop.f32.mrf.mxu3 }
 0x346   :  { %v403_v20 = vpack.c.bf16 %v398_v46, %v398_v46 }
 0x348   :  { %v693_v54 = vunpack.c.l.b16 %v403_v20 }
 0x34a   :  { %v695_v56 = vpack.c.b16 %v693_v54, %v693_v54 }
 0x34d   :  { %v400_v47 = vpop.f32.mrf.mxu3 }
 0x385   :  { %v520_v48 = vpop.f32.mrf.mxu2  ;;  %v697_v11 = vpop.permute.xlu2 %696 }
 0x386   :  { %v545_v49 = vpack.c.bf16 %v520_v48, %v520_v48  ;;  %v722_v10 = vsel %vm120_vm1, %v259_v12, %v697_v11 }
 0x388   :  { %v702_v50 = vunpack.c.l.b16 %v545_v49 }
 0x38a   :  { %v704_v51 = vpack.c.b16 %v702_v50, %v702_v50 }
 0x38c   :  { %706 = vrot.lane.b32.xlu1 %v704_v51, %s1056_s24 }
 0x38d   :  { %v522_v52 = vpop.f32.mrf.mxu2  ;;  %v541_v53 = vpop.f32.mrf.mxu3 }
 0x38e   :  { %v546_v55 = vpack.c.bf16 %v541_v53, %v541_v53 }
 0x390   :  { %v703_v59 = vunpack.c.l.b16 %v546_v55 }
 0x392   :  { %v705_v26 = vpack.c.b16 %v703_v59, %v703_v59 }
 0x394   :  { %698 = vrot.lane.b32.xlu1 %v695_v56, %s1044_s1 }
 0x395   :  { %v543_v57 = vpop.f32.mrf.mxu3  ;;  %v663_v58 = vpop.f32.mrf.mxu2 }
 0x396   :  { %v688_v60 = vpack.c.bf16 %v663_v58, %v663_v58 }
 0x398   :  { %v712_v61 = vunpack.c.l.b16 %v688_v60 }
 0x39a   :  { %v714_v62 = vpack.c.b16 %v712_v61, %v712_v61 }
 0x39c   :  { %708 = vrot.lane.b32.xlu1 %v705_v26, %s1056_s24  ;;  %716 = vrot.lane.b32.xlu0 %v714_v62, %s1057_s25 }
 0x39d   :  { %v665_v63 = vpop.f32.mrf.mxu2  ;;  %v684_v0 = vpop.f32.mrf.mxu3 }
 0x39e   :  { %v689_v15 = vpack.c.bf16 %v684_v0, %v684_v0 }
 0x3a0   :  { %v713_v1 = vunpack.c.l.b16 %v689_v15 }
 0x3a2   :  { %v715_v2 = vpack.c.b16 %v713_v1, %v713_v1 }
 0x3a4   :  { %718 = vrot.lane.b32.xlu2 %v715_v2, %s1057_s25 }
 0x3a5   :  { %v686_v3 = vpop.f32.mrf.mxu3 }
 0x3fe   :  { %v707_v8 = vpop.permute.xlu1 %706  ;;  %v719_v37 = vpop.permute.xlu2 %718 }
 0x3ff   :  { %v728_v14 = vsel %vm726_vm2, %v722_v10, %v707_v8 }
 0x406   :  { %v699_v9 = vpop.permute.xlu1 %698 }
 0x407   :  { %v725_v4 = vsel %vm120_vm1, %v260_v13, %v699_v9 }
 0x40e   :  { %v709_v16 = vpop.permute.xlu1 %708  ;;  %v717_v5 = vpop.permute.xlu0 %716 }
 0x40f   :  { %v730_v18 = vsel %vm726_vm2, %v725_v4, %v709_v16  ;;  %v733_v19 = vsel %vm731_vm9, %v728_v14, %v717_v5 }
 0x410   :  { %v735_v21 = vsel %vm731_vm9, %v730_v18, %v719_v37  ;;  %v746_v22 = vunpack.c.l.b16 %v733_v19 }
 0x411   :  { %v747_v23 = vunpack.c.l.b16 %v735_v21 }
 0x413   :  { %v748_v24 = vpack.c.b16 %v747_v23, %v746_v22 }
 0x415   :  { %851 = vmatmul.msk.bf16.vlgmr.msra.gmra.mxu0 %vm95_vm0, %v748_v24 }
 0x492   :  { %v773_v27 = vpop.f32.mrf.mxu0 }
 0x493   :  { %v774_v28 = vadd.f32 %v878_v25, %v773_v27 }
 0x495   :  { %778 = vst.msk [vmem:[#allocation8] sm:$0xff] %vm95_vm0, %v774_v28 }
 0x49a   :  { %v775_v29 = vpop.f32.mrf.mxu0 }
 0x49b   :  { %v776_v30 = vadd.f32 %v878_v25, %v775_v29 }
 0x49d   :  { %779 = vst.msk [vmem:[#allocation8 + $0x8] sm:$0xff] %vm95_vm0, %v776_v30 }
 0x49e   :  { %792 = dma.vmem_to_hbm [thread:$0]  %s785_s11, 256, %s787_s6, [#allocation4], %s1043_s9, %s1043_s9, %s1044_s1  }
 0x49f   :  { %1035 = dma.done.wait [#allocation4], 256  }
 0x4a0   :  { %1036 = vsyncadd [#allocation4], 4294967040 }
 0x4a1   :  { %1037 = dma.done.wait [#allocation10], 1024  }
 0x4a2   :  { %1038 = vsyncadd [#allocation10], 4294966272 }
 0x4a3   :  { %814 = vsyncpa [#allocation3], 1 }
 0x4a4   :  { %815 = vsyncpa [#allocation6], 1 }
 0x4a5   :  { %816 = vsyncpa [#allocation4], 1 }
 0x4a6   :  { %817 = vsyncpa [#allocation10], 1 }

</bundles_post_ra>
